<compile_context>
chip_gen: v7x
topology: tpu7x:2x2x1
jax: 0.10.0
libtpu: 0.0.40
codegen_flags: <defaults>
</compile_context>

<pallas_src>
import functools

import jax
import jax.numpy as jnp
import numpy as np
from jax.experimental import pallas as pl
from jax.experimental.pallas import tpu as pltpu


def _crop_kernel(coords_ref, dy_ref, dxt_ref, inp_ref, out_ref, *, Bblk, cx, cy):
    """Processes Bblk batches per grid step.

    coords_ref: SMEM (2B,) int32, [x0, y0, x1, y1, ...]
    dy_ref:     VMEM (Ht, H) f32 constant, dy[i, h]  = h - i
    dxt_ref:    VMEM (W, Wt) f32 constant, dxt[w, j] = w - j
    inp_ref:    VMEM (Bblk, H, W) input block
    out_ref:    VMEM (1, Ht, Bblk*Wt) lane-dense output slab
    """
    g = pl.program_id(0)
    dy = dy_ref[...]
    dxt = dxt_ref[...]

    tiles = []
    for b in range(Bblk):  # static unroll over the batch block
        base = 2 * (g * Bblk + b)
        x = coords_ref[base].astype(jnp.float32)
        y = coords_ref[base + 1].astype(jnp.float32)

        # Row weights  Wy[i, h]  = relu(1 - |(y + cy) - (h - i)|), shape (Ht, H)
        # Col weights  WxT[w, j] = relu(1 - |(x + cx) - (w - j)|), shape (W, Wt)
        wy = jnp.maximum(0.0, 1.0 - jnp.abs((y + cy) - dy))
        wxt = jnp.maximum(0.0, 1.0 - jnp.abs((x + cx) - dxt))

        inp = inp_ref[b].astype(jnp.float32)                              # (H, W)
        tmp = jnp.dot(wy, inp, preferred_element_type=jnp.float32)        # (Ht, W)
        tiles.append(jnp.dot(tmp, wxt, preferred_element_type=jnp.float32))  # (Ht, Wt)

    slab = jnp.concatenate(tiles, axis=-1)  # (Ht, Bblk*Wt), lane-dense

    # torch.round rounds half to even, as does jnp.round.
    # TODO(synk): PyTorch returns int64 (.long()); int32 used here (JAX x64 disabled).
    out_ref[0] = jnp.round(slab).astype(jnp.int32)


def _pick_block_b(B, preferred=8):
    bb = min(preferred, B)
    while B % bb:
        bb -= 1
    return bb


def crop(inputs, coordinates, height_target, width_target, block_b=8):
    """inputs: [B, H, W] (any real dtype), coordinates: [B, 2] int (x, y) -> [B, Ht, Wt] int32."""
    B, H, W = inputs.shape
    Ht, Wt = height_target, width_target
    Bblk = _pick_block_b(B, block_b)
    G = B // Bblk

    # Constant pieces of the pixel-space sample coordinates (align_corners=True inverse map):
    #   px[b, j] = x_b + cx + j ,  py[b, i] = y_b + cy + i
    cx = (W - 1) / 2.0 - float(W // 2) + float((-Wt) // 2)
    cy = (H - 1) / 2.0 - float(H // 2) + float((-Ht) // 2)

    # Host-precomputed constant difference matrices (hoists all in-kernel iotas).
    dy = (jnp.arange(H, dtype=jnp.float32)[None, :]
          - jnp.arange(Ht, dtype=jnp.float32)[:, None])          # (Ht, H): h - i
    dxt = (jnp.arange(W, dtype=jnp.float32)[:, None]
           - jnp.arange(Wt, dtype=jnp.float32)[None, :])         # (W, Wt): w - j

    coords_flat = coordinates.reshape(-1).astype(jnp.int32)      # (2B,) 1-D for SMEM

    kernel = functools.partial(_crop_kernel, Bblk=Bblk, cx=cx, cy=cy)

    slab = pl.pallas_call(
        kernel,
        out_shape=jax.ShapeDtypeStruct((G, Ht, Bblk * Wt), jnp.int32),
        grid_spec=pltpu.PrefetchScalarGridSpec(
            num_scalar_prefetch=1,          # flattened coordinates land in SMEM
            grid=(G,),
            in_specs=[
                pl.BlockSpec((Ht, H), lambda g, c: (0, 0)),       # constant, fetched once
                pl.BlockSpec((W, Wt), lambda g, c: (0, 0)),       # constant, fetched once
                pl.BlockSpec((Bblk, H, W), lambda g, c: (g, 0, 0)),
            ],
            out_specs=pl.BlockSpec((1, Ht, Bblk * Wt), lambda g, c: (g, 0, 0)),
        ),
        compiler_params=pltpu.CompilerParams(dimension_semantics=("parallel",)),
    )(coords_flat, dy, dxt, inputs.astype(jnp.float32))

    # Un-interleave the lane-dense slab: slab[g, i, b*Wt + j] -> out[g*Bblk + b, i, j]
    out = slab.reshape(G, Ht, Bblk, Wt)
    out = jnp.transpose(out, (0, 2, 1, 3)).reshape(B, Ht, Wt)
    return out


def _ref_crop_numpy(inputs, coords, Ht, Wt):
    """Direct bilinear grid_sample reference (align_corners=True, zeros padding)."""
    B, H, W = inputs.shape
    out = np.zeros((B, Ht, Wt), np.int64)
    offx = np.arange((-Wt) // 2, Wt // 2)
    offy = np.arange((-Ht) // 2, Ht // 2)
    for b in range(B):
        x, y = float(coords[b, 0]), float(coords[b, 1])
        px = x - W // 2 + (W - 1) / 2.0 + offx
        py = y - H // 2 + (H - 1) / 2.0 + offy
        for i in range(Ht):
            for j in range(Wt):
                x0 = int(np.floor(px[j]))
                y0 = int(np.floor(py[i]))
                val = 0.0
                for dy_ in (0, 1):
                    for dx_ in (0, 1):
                        xx, yy = x0 + dx_, y0 + dy_
                        wgt = (1.0 - abs(px[j] - xx)) * (1.0 - abs(py[i] - yy))
                        if 0 <= xx < W and 0 <= yy < H:
                            val += wgt * inputs[b, yy, xx]
                out[b, i, j] = np.rint(val)
    return out


if __name__ == "__main__":
    # Shapes consistent with the module: Crop(height=16, width=16, 8, 8);
    # B=16 so the kernel runs 2 grid steps of 8 batches each.
    B, H, W = 16, 16, 16
    Ht, Wt = 8, 8

    key = jax.random.PRNGKey(0)
    k1, k2, k3 = jax.random.split(key, 3)
    # "glyph"-like integer-valued inputs, stored as float32
    inputs = jax.random.randint(k1, (B, H, W), 0, 10).astype(jnp.float32)
    xs = jax.random.randint(k2, (B, 1), 0, W)
    ys = jax.random.randint(k3, (B, 1), 0, H)
    coordinates = jnp.concatenate([xs, ys], axis=1).astype(jnp.int32)

    out = crop(inputs, coordinates, Ht, Wt)
    out = jax.block_until_ready(out)

    ref = _ref_crop_numpy(np.asarray(inputs), np.asarray(coordinates), Ht, Wt)
    np.testing.assert_array_equal(np.asarray(out, dtype=np.int64), ref)

    print("KERNEL_OK")
</pallas_src>

<mosaic_0001>
module attributes {stable_mosaic.version = 11 : i64} {
  func.func @_crop_kernel(%arg0: i32, %arg1: memref<32xi32, #tpu.memory_space<smem>>, %arg2: memref<8x16xf32, #tpu.memory_space<vmem>>, %arg3: memref<16x8xf32, #tpu.memory_space<vmem>>, %arg4: memref<8x16x16xf32, #tpu.memory_space<vmem>>, %arg5: memref<1x8x64xi32, #tpu.memory_space<vmem>>) attributes {dimension_semantics = [#tpu.dimension_semantics<parallel>], iteration_bounds = array<i64: 2>, scalar_prefetch = 1 : i64, scratch_operands = 0 : i64, tpu.core_type = #tpu.core_type<tc>, window_params = [{pipeline_mode = #tpu.pipeline_mode<synchronous>, transform_indices = @transform_0, window_bounds = array<i64: 8, 16>}, {pipeline_mode = #tpu.pipeline_mode<synchronous>, transform_indices = @transform_1, window_bounds = array<i64: 16, 8>}, {transform_indices = @transform_2, window_bounds = array<i64: 8, 16, 16>}, {transform_indices = @transform_3, window_bounds = array<i64: 1, 8, 64>}]} {
    %c0 = arith.constant 0 : index
    %c0_0 = arith.constant 0 : index
    %0 = vector.load %arg2[%c0, %c0_0] : memref<8x16xf32, #tpu.memory_space<vmem>>, vector<8x16xf32>
    %c0_1 = arith.constant 0 : index
    %c0_2 = arith.constant 0 : index
    %1 = vector.load %arg3[%c0_1, %c0_2] : memref<16x8xf32, #tpu.memory_space<vmem>>, vector<16x8xf32>
    %c8_i32 = arith.constant 8 : i32
    %2 = arith.muli %arg0, %c8_i32 : i32
    %c0_i32 = arith.constant 0 : i32
    %3 = arith.addi %2, %c0_i32 : i32
    %c2_i32 = arith.constant 2 : i32
    %4 = arith.muli %c2_i32, %3 : i32
    %5 = arith.index_cast %4 : i32 to index
    %6 = memref.load %arg1[%5] : memref<32xi32, #tpu.memory_space<smem>>
    %7 = arith.sitofp %6 : i32 to f32
    %c1_i32 = arith.constant 1 : i32
    %8 = arith.addi %4, %c1_i32 : i32
    %9 = arith.index_cast %8 : i32 to index
    %10 = memref.load %arg1[%9] : memref<32xi32, #tpu.memory_space<smem>>
    %11 = arith.sitofp %10 : i32 to f32
    %cst = arith.constant -4.500000e+00 : f32
    %12 = arith.addf %11, %cst : f32
    %13 = vector.broadcast %12 : f32 to vector<8x16xf32>
    %14 = arith.subf %13, %0 : vector<8x16xf32>
    %15 = math.absf %14 : vector<8x16xf32>
    %cst_3 = arith.constant 1.000000e+00 : f32
    %16 = vector.broadcast %cst_3 : f32 to vector<8x16xf32>
    %17 = arith.subf %16, %15 : vector<8x16xf32>
    %cst_4 = arith.constant 0.000000e+00 : f32
    %18 = vector.broadcast %cst_4 : f32 to vector<8x16xf32>
    %19 = arith.maximumf %18, %17 : vector<8x16xf32>
    %cst_5 = arith.constant -4.500000e+00 : f32
    %20 = arith.addf %7, %cst_5 : f32
    %21 = vector.broadcast %20 : f32 to vector<16x8xf32>
    %22 = arith.subf %21, %1 : vector<16x8xf32>
    %23 = math.absf %22 : vector<16x8xf32>
    %cst_6 = arith.constant 1.000000e+00 : f32
    %24 = vector.broadcast %cst_6 : f32 to vector<16x8xf32>
    %25 = arith.subf %24, %23 : vector<16x8xf32>
    %cst_7 = arith.constant 0.000000e+00 : f32
    %26 = vector.broadcast %cst_7 : f32 to vector<16x8xf32>
    %27 = arith.maximumf %26, %25 : vector<16x8xf32>
    %c0_8 = arith.constant 0 : index
    %c0_9 = arith.constant 0 : index
    %c0_10 = arith.constant 0 : index
    %28 = vector.load %arg4[%c0_8, %c0_9, %c0_10] : memref<8x16x16xf32, #tpu.memory_space<vmem>>, vector<1x16x16xf32>
    %29 = vector.shape_cast %28 : vector<1x16x16xf32> to vector<16x16xf32>
    %cst_11 = arith.constant dense<0.000000e+00> : vector<8x16xf32>
    %30 = tpu.matmul %19, %29, %cst_11 {dimension_numbers = #tpu.dot_dimension_numbers<[1], [0], [0], [1], [0, 0, 1, 1], [], []>} : vector<8x16xf32>, vector<16x16xf32>, vector<8x16xf32> -> vector<8x16xf32>
    %cst_12 = arith.constant dense<0.000000e+00> : vector<8x8xf32>
    %31 = tpu.matmul %30, %27, %cst_12 {dimension_numbers = #tpu.dot_dimension_numbers<[1], [0], [0], [1], [0, 0, 1, 1], [], []>} : vector<8x16xf32>, vector<16x8xf32>, vector<8x8xf32> -> vector<8x8xf32>
    %c8_i32_13 = arith.constant 8 : i32
    %32 = arith.muli %arg0, %c8_i32_13 : i32
    %c1_i32_14 = arith.constant 1 : i32
    %33 = arith.addi %32, %c1_i32_14 : i32
    %c2_i32_15 = arith.constant 2 : i32
    %34 = arith.muli %c2_i32_15, %33 : i32
    %35 = arith.index_cast %34 : i32 to index
    %36 = memref.load %arg1[%35] : memref<32xi32, #tpu.memory_space<smem>>
    %37 = arith.sitofp %36 : i32 to f32
    %c1_i32_16 = arith.constant 1 : i32
    %38 = arith.addi %34, %c1_i32_16 : i32
    %39 = arith.index_cast %38 : i32 to index
    %40 = memref.load %arg1[%39] : memref<32xi32, #tpu.memory_space<smem>>
    %41 = arith.sitofp %40 : i32 to f32
    %cst_17 = arith.constant -4.500000e+00 : f32
    %42 = arith.addf %41, %cst_17 : f32
    %43 = vector.broadcast %42 : f32 to vector<8x16xf32>
    %44 = arith.subf %43, %0 : vector<8x16xf32>
    %45 = math.absf %44 : vector<8x16xf32>
    %cst_18 = arith.constant 1.000000e+00 : f32
    %46 = vector.broadcast %cst_18 : f32 to vector<8x16xf32>
    %47 = arith.subf %46, %45 : vector<8x16xf32>
    %cst_19 = arith.constant 0.000000e+00 : f32
    %48 = vector.broadcast %cst_19 : f32 to vector<8x16xf32>
    %49 = arith.maximumf %48, %47 : vector<8x16xf32>
    %cst_20 = arith.constant -4.500000e+00 : f32
    %50 = arith.addf %37, %cst_20 : f32
    %51 = vector.broadcast %50 : f32 to vector<16x8xf32>
    %52 = arith.subf %51, %1 : vector<16x8xf32>
    %53 = math.absf %52 : vector<16x8xf32>
    %cst_21 = arith.constant 1.000000e+00 : f32
    %54 = vector.broadcast %cst_21 : f32 to vector<16x8xf32>
    %55 = arith.subf %54, %53 : vector<16x8xf32>
    %cst_22 = arith.constant 0.000000e+00 : f32
    %56 = vector.broadcast %cst_22 : f32 to vector<16x8xf32>
    %57 = arith.maximumf %56, %55 : vector<16x8xf32>
    %c1 = arith.constant 1 : index
    %c0_23 = arith.constant 0 : index
    %c0_24 = arith.constant 0 : index
    %58 = vector.load %arg4[%c1, %c0_23, %c0_24] : memref<8x16x16xf32, #tpu.memory_space<vmem>>, vector<1x16x16xf32>
    %59 = vector.shape_cast %58 : vector<1x16x16xf32> to vector<16x16xf32>
    %cst_25 = arith.constant dense<0.000000e+00> : vector<8x16xf32>
    %60 = tpu.matmul %49, %59, %cst_25 {dimension_numbers = #tpu.dot_dimension_numbers<[1], [0], [0], [1], [0, 0, 1, 1], [], []>} : vector<8x16xf32>, vector<16x16xf32>, vector<8x16xf32> -> vector<8x16xf32>
    %cst_26 = arith.constant dense<0.000000e+00> : vector<8x8xf32>
    %61 = tpu.matmul %60, %57, %cst_26 {dimension_numbers = #tpu.dot_dimension_numbers<[1], [0], [0], [1], [0, 0, 1, 1], [], []>} : vector<8x16xf32>, vector<16x8xf32>, vector<8x8xf32> -> vector<8x8xf32>
    %c8_i32_27 = arith.constant 8 : i32
    %62 = arith.muli %arg0, %c8_i32_27 : i32
    %c2_i32_28 = arith.constant 2 : i32
    %63 = arith.addi %62, %c2_i32_28 : i32
    %c2_i32_29 = arith.constant 2 : i32
    %64 = arith.muli %c2_i32_29, %63 : i32
    %65 = arith.index_cast %64 : i32 to index
    %66 = memref.load %arg1[%65] : memref<32xi32, #tpu.memory_space<smem>>
    %67 = arith.sitofp %66 : i32 to f32
    %c1_i32_30 = arith.constant 1 : i32
    %68 = arith.addi %64, %c1_i32_30 : i32
    %69 = arith.index_cast %68 : i32 to index
    %70 = memref.load %arg1[%69] : memref<32xi32, #tpu.memory_space<smem>>
    %71 = arith.sitofp %70 : i32 to f32
    %cst_31 = arith.constant -4.500000e+00 : f32
    %72 = arith.addf %71, %cst_31 : f32
    %73 = vector.broadcast %72 : f32 to vector<8x16xf32>
    %74 = arith.subf %73, %0 : vector<8x16xf32>
    %75 = math.absf %74 : vector<8x16xf32>
    %cst_32 = arith.constant 1.000000e+00 : f32
    %76 = vector.broadcast %cst_32 : f32 to vector<8x16xf32>
    %77 = arith.subf %76, %75 : vector<8x16xf32>
    %cst_33 = arith.constant 0.000000e+00 : f32
    %78 = vector.broadcast %cst_33 : f32 to vector<8x16xf32>
    %79 = arith.maximumf %78, %77 : vector<8x16xf32>
    %cst_34 = arith.constant -4.500000e+00 : f32
    %80 = arith.addf %67, %cst_34 : f32
    %81 = vector.broadcast %80 : f32 to vector<16x8xf32>
    %82 = arith.subf %81, %1 : vector<16x8xf32>
    %83 = math.absf %82 : vector<16x8xf32>
    %cst_35 = arith.constant 1.000000e+00 : f32
    %84 = vector.broadcast %cst_35 : f32 to vector<16x8xf32>
    %85 = arith.subf %84, %83 : vector<16x8xf32>
    %cst_36 = arith.constant 0.000000e+00 : f32
    %86 = vector.broadcast %cst_36 : f32 to vector<16x8xf32>
    %87 = arith.maximumf %86, %85 : vector<16x8xf32>
    %c2 = arith.constant 2 : index
    %c0_37 = arith.constant 0 : index
    %c0_38 = arith.constant 0 : index
    %88 = vector.load %arg4[%c2, %c0_37, %c0_38] : memref<8x16x16xf32, #tpu.memory_space<vmem>>, vector<1x16x16xf32>
    %89 = vector.shape_cast %88 : vector<1x16x16xf32> to vector<16x16xf32>
    %cst_39 = arith.constant dense<0.000000e+00> : vector<8x16xf32>
    %90 = tpu.matmul %79, %89, %cst_39 {dimension_numbers = #tpu.dot_dimension_numbers<[1], [0], [0], [1], [0, 0, 1, 1], [], []>} : vector<8x16xf32>, vector<16x16xf32>, vector<8x16xf32> -> vector<8x16xf32>
    %cst_40 = arith.constant dense<0.000000e+00> : vector<8x8xf32>
    %91 = tpu.matmul %90, %87, %cst_40 {dimension_numbers = #tpu.dot_dimension_numbers<[1], [0], [0], [1], [0, 0, 1, 1], [], []>} : vector<8x16xf32>, vector<16x8xf32>, vector<8x8xf32> -> vector<8x8xf32>
    %c8_i32_41 = arith.constant 8 : i32
    %92 = arith.muli %arg0, %c8_i32_41 : i32
    %c3_i32 = arith.constant 3 : i32
    %93 = arith.addi %92, %c3_i32 : i32
    %c2_i32_42 = arith.constant 2 : i32
    %94 = arith.muli %c2_i32_42, %93 : i32
    %95 = arith.index_cast %94 : i32 to index
    %96 = memref.load %arg1[%95] : memref<32xi32, #tpu.memory_space<smem>>
    %97 = arith.sitofp %96 : i32 to f32
    %c1_i32_43 = arith.constant 1 : i32
    %98 = arith.addi %94, %c1_i32_43 : i32
    %99 = arith.index_cast %98 : i32 to index
    %100 = memref.load %arg1[%99] : memref<32xi32, #tpu.memory_space<smem>>
    %101 = arith.sitofp %100 : i32 to f32
    %cst_44 = arith.constant -4.500000e+00 : f32
    %102 = arith.addf %101, %cst_44 : f32
    %103 = vector.broadcast %102 : f32 to vector<8x16xf32>
    %104 = arith.subf %103, %0 : vector<8x16xf32>
    %105 = math.absf %104 : vector<8x16xf32>
    %cst_45 = arith.constant 1.000000e+00 : f32
    %106 = vector.broadcast %cst_45 : f32 to vector<8x16xf32>
    %107 = arith.subf %106, %105 : vector<8x16xf32>
    %cst_46 = arith.constant 0.000000e+00 : f32
    %108 = vector.broadcast %cst_46 : f32 to vector<8x16xf32>
    %109 = arith.maximumf %108, %107 : vector<8x16xf32>
    %cst_47 = arith.constant -4.500000e+00 : f32
    %110 = arith.addf %97, %cst_47 : f32
    %111 = vector.broadcast %110 : f32 to vector<16x8xf32>
    %112 = arith.subf %111, %1 : vector<16x8xf32>
    %113 = math.absf %112 : vector<16x8xf32>
    %cst_48 = arith.constant 1.000000e+00 : f32
    %114 = vector.broadcast %cst_48 : f32 to vector<16x8xf32>
    %115 = arith.subf %114, %113 : vector<16x8xf32>
    %cst_49 = arith.constant 0.000000e+00 : f32
    %116 = vector.broadcast %cst_49 : f32 to vector<16x8xf32>
    %117 = arith.maximumf %116, %115 : vector<16x8xf32>
    %c3 = arith.constant 3 : index
    %c0_50 = arith.constant 0 : index
    %c0_51 = arith.constant 0 : index
    %118 = vector.load %arg4[%c3, %c0_50, %c0_51] : memref<8x16x16xf32, #tpu.memory_space<vmem>>, vector<1x16x16xf32>
    %119 = vector.shape_cast %118 : vector<1x16x16xf32> to vector<16x16xf32>
    %cst_52 = arith.constant dense<0.000000e+00> : vector<8x16xf32>
    %120 = tpu.matmul %109, %119, %cst_52 {dimension_numbers = #tpu.dot_dimension_numbers<[1], [0], [0], [1], [0, 0, 1, 1], [], []>} : vector<8x16xf32>, vector<16x16xf32>, vector<8x16xf32> -> vector<8x16xf32>
    %cst_53 = arith.constant dense<0.000000e+00> : vector<8x8xf32>
    %121 = tpu.matmul %120, %117, %cst_53 {dimension_numbers = #tpu.dot_dimension_numbers<[1], [0], [0], [1], [0, 0, 1, 1], [], []>} : vector<8x16xf32>, vector<16x8xf32>, vector<8x8xf32> -> vector<8x8xf32>
    %c8_i32_54 = arith.constant 8 : i32
    %122 = arith.muli %arg0, %c8_i32_54 : i32
    %c4_i32 = arith.constant 4 : i32
    %123 = arith.addi %122, %c4_i32 : i32
    %c2_i32_55 = arith.constant 2 : i32
    %124 = arith.muli %c2_i32_55, %123 : i32
    %125 = arith.index_cast %124 : i32 to index
    %126 = memref.load %arg1[%125] : memref<32xi32, #tpu.memory_space<smem>>
    %127 = arith.sitofp %126 : i32 to f32
    %c1_i32_56 = arith.constant 1 : i32
    %128 = arith.addi %124, %c1_i32_56 : i32
    %129 = arith.index_cast %128 : i32 to index
    %130 = memref.load %arg1[%129] : memref<32xi32, #tpu.memory_space<smem>>
    %131 = arith.sitofp %130 : i32 to f32
    %cst_57 = arith.constant -4.500000e+00 : f32
    %132 = arith.addf %131, %cst_57 : f32
    %133 = vector.broadcast %132 : f32 to vector<8x16xf32>
    %134 = arith.subf %133, %0 : vector<8x16xf32>
    %135 = math.absf %134 : vector<8x16xf32>
    %cst_58 = arith.constant 1.000000e+00 : f32
    %136 = vector.broadcast %cst_58 : f32 to vector<8x16xf32>
    %137 = arith.subf %136, %135 : vector<8x16xf32>
    %cst_59 = arith.constant 0.000000e+00 : f32
    %138 = vector.broadcast %cst_59 : f32 to vector<8x16xf32>
    %139 = arith.maximumf %138, %137 : vector<8x16xf32>
    %cst_60 = arith.constant -4.500000e+00 : f32
    %140 = arith.addf %127, %cst_60 : f32
    %141 = vector.broadcast %140 : f32 to vector<16x8xf32>
    %142 = arith.subf %141, %1 : vector<16x8xf32>
    %143 = math.absf %142 : vector<16x8xf32>
    %cst_61 = arith.constant 1.000000e+00 : f32
    %144 = vector.broadcast %cst_61 : f32 to vector<16x8xf32>
    %145 = arith.subf %144, %143 : vector<16x8xf32>
    %cst_62 = arith.constant 0.000000e+00 : f32
    %146 = vector.broadcast %cst_62 : f32 to vector<16x8xf32>
    %147 = arith.maximumf %146, %145 : vector<16x8xf32>
    %c4 = arith.constant 4 : index
    %c0_63 = arith.constant 0 : index
    %c0_64 = arith.constant 0 : index
    %148 = vector.load %arg4[%c4, %c0_63, %c0_64] : memref<8x16x16xf32, #tpu.memory_space<vmem>>, vector<1x16x16xf32>
    %149 = vector.shape_cast %148 : vector<1x16x16xf32> to vector<16x16xf32>
    %cst_65 = arith.constant dense<0.000000e+00> : vector<8x16xf32>
    %150 = tpu.matmul %139, %149, %cst_65 {dimension_numbers = #tpu.dot_dimension_numbers<[1], [0], [0], [1], [0, 0, 1, 1], [], []>} : vector<8x16xf32>, vector<16x16xf32>, vector<8x16xf32> -> vector<8x16xf32>
    %cst_66 = arith.constant dense<0.000000e+00> : vector<8x8xf32>
    %151 = tpu.matmul %150, %147, %cst_66 {dimension_numbers = #tpu.dot_dimension_numbers<[1], [0], [0], [1], [0, 0, 1, 1], [], []>} : vector<8x16xf32>, vector<16x8xf32>, vector<8x8xf32> -> vector<8x8xf32>
    %c8_i32_67 = arith.constant 8 : i32
    %152 = arith.muli %arg0, %c8_i32_67 : i32
    %c5_i32 = arith.constant 5 : i32
    %153 = arith.addi %152, %c5_i32 : i32
    %c2_i32_68 = arith.constant 2 : i32
    %154 = arith.muli %c2_i32_68, %153 : i32
    %155 = arith.index_cast %154 : i32 to index
    %156 = memref.load %arg1[%155] : memref<32xi32, #tpu.memory_space<smem>>
    %157 = arith.sitofp %156 : i32 to f32
    %c1_i32_69 = arith.constant 1 : i32
    %158 = arith.addi %154, %c1_i32_69 : i32
    %159 = arith.index_cast %158 : i32 to index
    %160 = memref.load %arg1[%159] : memref<32xi32, #tpu.memory_space<smem>>
    %161 = arith.sitofp %160 : i32 to f32
    %cst_70 = arith.constant -4.500000e+00 : f32
    %162 = arith.addf %161, %cst_70 : f32
    %163 = vector.broadcast %162 : f32 to vector<8x16xf32>
    %164 = arith.subf %163, %0 : vector<8x16xf32>
    %165 = math.absf %164 : vector<8x16xf32>
    %cst_71 = arith.constant 1.000000e+00 : f32
    %166 = vector.broadcast %cst_71 : f32 to vector<8x16xf32>
    %167 = arith.subf %166, %165 : vector<8x16xf32>
    %cst_72 = arith.constant 0.000000e+00 : f32
    %168 = vector.broadcast %cst_72 : f32 to vector<8x16xf32>
    %169 = arith.maximumf %168, %167 : vector<8x16xf32>
    %cst_73 = arith.constant -4.500000e+00 : f32
    %170 = arith.addf %157, %cst_73 : f32
    %171 = vector.broadcast %170 : f32 to vector<16x8xf32>
    %172 = arith.subf %171, %1 : vector<16x8xf32>
    %173 = math.absf %172 : vector<16x8xf32>
    %cst_74 = arith.constant 1.000000e+00 : f32
    %174 = vector.broadcast %cst_74 : f32 to vector<16x8xf32>
    %175 = arith.subf %174, %173 : vector<16x8xf32>
    %cst_75 = arith.constant 0.000000e+00 : f32
    %176 = vector.broadcast %cst_75 : f32 to vector<16x8xf32>
    %177 = arith.maximumf %176, %175 : vector<16x8xf32>
    %c5 = arith.constant 5 : index
    %c0_76 = arith.constant 0 : index
    %c0_77 = arith.constant 0 : index
    %178 = vector.load %arg4[%c5, %c0_76, %c0_77] : memref<8x16x16xf32, #tpu.memory_space<vmem>>, vector<1x16x16xf32>
    %179 = vector.shape_cast %178 : vector<1x16x16xf32> to vector<16x16xf32>
    %cst_78 = arith.constant dense<0.000000e+00> : vector<8x16xf32>
    %180 = tpu.matmul %169, %179, %cst_78 {dimension_numbers = #tpu.dot_dimension_numbers<[1], [0], [0], [1], [0, 0, 1, 1], [], []>} : vector<8x16xf32>, vector<16x16xf32>, vector<8x16xf32> -> vector<8x16xf32>
    %cst_79 = arith.constant dense<0.000000e+00> : vector<8x8xf32>
    %181 = tpu.matmul %180, %177, %cst_79 {dimension_numbers = #tpu.dot_dimension_numbers<[1], [0], [0], [1], [0, 0, 1, 1], [], []>} : vector<8x16xf32>, vector<16x8xf32>, vector<8x8xf32> -> vector<8x8xf32>
    %c8_i32_80 = arith.constant 8 : i32
    %182 = arith.muli %arg0, %c8_i32_80 : i32
    %c6_i32 = arith.constant 6 : i32
    %183 = arith.addi %182, %c6_i32 : i32
    %c2_i32_81 = arith.constant 2 : i32
    %184 = arith.muli %c2_i32_81, %183 : i32
    %185 = arith.index_cast %184 : i32 to index
    %186 = memref.load %arg1[%185] : memref<32xi32, #tpu.memory_space<smem>>
    %187 = arith.sitofp %186 : i32 to f32
    %c1_i32_82 = arith.constant 1 : i32
    %188 = arith.addi %184, %c1_i32_82 : i32
    %189 = arith.index_cast %188 : i32 to index
    %190 = memref.load %arg1[%189] : memref<32xi32, #tpu.memory_space<smem>>
    %191 = arith.sitofp %190 : i32 to f32
    %cst_83 = arith.constant -4.500000e+00 : f32
    %192 = arith.addf %191, %cst_83 : f32
    %193 = vector.broadcast %192 : f32 to vector<8x16xf32>
    %194 = arith.subf %193, %0 : vector<8x16xf32>
    %195 = math.absf %194 : vector<8x16xf32>
    %cst_84 = arith.constant 1.000000e+00 : f32
    %196 = vector.broadcast %cst_84 : f32 to vector<8x16xf32>
    %197 = arith.subf %196, %195 : vector<8x16xf32>
    %cst_85 = arith.constant 0.000000e+00 : f32
    %198 = vector.broadcast %cst_85 : f32 to vector<8x16xf32>
    %199 = arith.maximumf %198, %197 : vector<8x16xf32>
    %cst_86 = arith.constant -4.500000e+00 : f32
    %200 = arith.addf %187, %cst_86 : f32
    %201 = vector.broadcast %200 : f32 to vector<16x8xf32>
    %202 = arith.subf %201, %1 : vector<16x8xf32>
    %203 = math.absf %202 : vector<16x8xf32>
    %cst_87 = arith.constant 1.000000e+00 : f32
    %204 = vector.broadcast %cst_87 : f32 to vector<16x8xf32>
    %205 = arith.subf %204, %203 : vector<16x8xf32>
    %cst_88 = arith.constant 0.000000e+00 : f32
    %206 = vector.broadcast %cst_88 : f32 to vector<16x8xf32>
    %207 = arith.maximumf %206, %205 : vector<16x8xf32>
    %c6 = arith.constant 6 : index
    %c0_89 = arith.constant 0 : index
    %c0_90 = arith.constant 0 : index
    %208 = vector.load %arg4[%c6, %c0_89, %c0_90] : memref<8x16x16xf32, #tpu.memory_space<vmem>>, vector<1x16x16xf32>
    %209 = vector.shape_cast %208 : vector<1x16x16xf32> to vector<16x16xf32>
    %cst_91 = arith.constant dense<0.000000e+00> : vector<8x16xf32>
    %210 = tpu.matmul %199, %209, %cst_91 {dimension_numbers = #tpu.dot_dimension_numbers<[1], [0], [0], [1], [0, 0, 1, 1], [], []>} : vector<8x16xf32>, vector<16x16xf32>, vector<8x16xf32> -> vector<8x16xf32>
    %cst_92 = arith.constant dense<0.000000e+00> : vector<8x8xf32>
    %211 = tpu.matmul %210, %207, %cst_92 {dimension_numbers = #tpu.dot_dimension_numbers<[1], [0], [0], [1], [0, 0, 1, 1], [], []>} : vector<8x16xf32>, vector<16x8xf32>, vector<8x8xf32> -> vector<8x8xf32>
    %c8_i32_93 = arith.constant 8 : i32
    %212 = arith.muli %arg0, %c8_i32_93 : i32
    %c7_i32 = arith.constant 7 : i32
    %213 = arith.addi %212, %c7_i32 : i32
    %c2_i32_94 = arith.constant 2 : i32
    %214 = arith.muli %c2_i32_94, %213 : i32
    %215 = arith.index_cast %214 : i32 to index
    %216 = memref.load %arg1[%215] : memref<32xi32, #tpu.memory_space<smem>>
    %217 = arith.sitofp %216 : i32 to f32
    %c1_i32_95 = arith.constant 1 : i32
    %218 = arith.addi %214, %c1_i32_95 : i32
    %219 = arith.index_cast %218 : i32 to index
    %220 = memref.load %arg1[%219] : memref<32xi32, #tpu.memory_space<smem>>
    %221 = arith.sitofp %220 : i32 to f32
    %cst_96 = arith.constant -4.500000e+00 : f32
    %222 = arith.addf %221, %cst_96 : f32
    %223 = vector.broadcast %222 : f32 to vector<8x16xf32>
    %224 = arith.subf %223, %0 : vector<8x16xf32>
    %225 = math.absf %224 : vector<8x16xf32>
    %cst_97 = arith.constant 1.000000e+00 : f32
    %226 = vector.broadcast %cst_97 : f32 to vector<8x16xf32>
    %227 = arith.subf %226, %225 : vector<8x16xf32>
    %cst_98 = arith.constant 0.000000e+00 : f32
    %228 = vector.broadcast %cst_98 : f32 to vector<8x16xf32>
    %229 = arith.maximumf %228, %227 : vector<8x16xf32>
    %cst_99 = arith.constant -4.500000e+00 : f32
    %230 = arith.addf %217, %cst_99 : f32
    %231 = vector.broadcast %230 : f32 to vector<16x8xf32>
    %232 = arith.subf %231, %1 : vector<16x8xf32>
    %233 = math.absf %232 : vector<16x8xf32>
    %cst_100 = arith.constant 1.000000e+00 : f32
    %234 = vector.broadcast %cst_100 : f32 to vector<16x8xf32>
    %235 = arith.subf %234, %233 : vector<16x8xf32>
    %cst_101 = arith.constant 0.000000e+00 : f32
    %236 = vector.broadcast %cst_101 : f32 to vector<16x8xf32>
    %237 = arith.maximumf %236, %235 : vector<16x8xf32>
    %c7 = arith.constant 7 : index
    %c0_102 = arith.constant 0 : index
    %c0_103 = arith.constant 0 : index
    %238 = vector.load %arg4[%c7, %c0_102, %c0_103] : memref<8x16x16xf32, #tpu.memory_space<vmem>>, vector<1x16x16xf32>
    %239 = vector.shape_cast %238 : vector<1x16x16xf32> to vector<16x16xf32>
    %cst_104 = arith.constant dense<0.000000e+00> : vector<8x16xf32>
    %240 = tpu.matmul %229, %239, %cst_104 {dimension_numbers = #tpu.dot_dimension_numbers<[1], [0], [0], [1], [0, 0, 1, 1], [], []>} : vector<8x16xf32>, vector<16x16xf32>, vector<8x16xf32> -> vector<8x16xf32>
    %cst_105 = arith.constant dense<0.000000e+00> : vector<8x8xf32>
    %241 = tpu.matmul %240, %237, %cst_105 {dimension_numbers = #tpu.dot_dimension_numbers<[1], [0], [0], [1], [0, 0, 1, 1], [], []>} : vector<8x16xf32>, vector<16x8xf32>, vector<8x8xf32> -> vector<8x8xf32>
    %242 = tpu.concatenate %31, %61, %91, %121, %151, %181, %211, %241 in 1 : vector<8x8xf32>, vector<8x8xf32>, vector<8x8xf32>, vector<8x8xf32>, vector<8x8xf32>, vector<8x8xf32>, vector<8x8xf32>, vector<8x8xf32> -> vector<8x64xf32>
    %243 = math.roundeven %242 : vector<8x64xf32>
    %244 = arith.fptosi %243 : vector<8x64xf32> to vector<8x64xi32>
    %c0_106 = arith.constant 0 : index
    %c0_107 = arith.constant 0 : index
    %c0_108 = arith.constant 0 : index
    %245 = vector.load %arg5[%c0_106, %c0_107, %c0_108] : memref<1x8x64xi32, #tpu.memory_space<vmem>>, vector<1x8x64xi32>
    %246 = vector.shape_cast %245 : vector<1x8x64xi32> to vector<8x64xi32>
    %247 = vector.shape_cast %244 : vector<8x64xi32> to vector<1x8x64xi32>
    tpu.vector_store %arg5[%c0_106, %c0_107, %c0_108], %247 {strides = array<i32>} : memref<1x8x64xi32, #tpu.memory_space<vmem>>, vector<1x8x64xi32>,
    return
  }
  func.func @transform_0(%arg0: i32, %arg1: memref<32xi32, #tpu.memory_space<smem>>) -> (i32, i32) {
    %c0_i32 = arith.constant 0 : i32
    %c0_i32_0 = arith.constant 0 : i32
    %c0_i32_1 = arith.constant 0 : i32
    return %c0_i32, %c0_i32_0 : i32, i32
  }
  func.func @transform_1(%arg0: i32, %arg1: memref<32xi32, #tpu.memory_space<smem>>) -> (i32, i32) {
    %c0_i32 = arith.constant 0 : i32
    %c0_i32_0 = arith.constant 0 : i32
    %c0_i32_1 = arith.constant 0 : i32
    return %c0_i32, %c0_i32_0 : i32, i32
  }
  func.func @transform_2(%arg0: i32, %arg1: memref<32xi32, #tpu.memory_space<smem>>) -> (i32, i32, i32) {
    %c0_i32 = arith.constant 0 : i32
    %c0_i32_0 = arith.constant 0 : i32
    %c0_i32_1 = arith.constant 0 : i32
    return %arg0, %c0_i32, %c0_i32_0 : i32, i32, i32
  }
  func.func @transform_3(%arg0: i32, %arg1: memref<32xi32, #tpu.memory_space<smem>>) -> (i32, i32, i32) {
    %c0_i32 = arith.constant 0 : i32
    %c0_i32_0 = arith.constant 0 : i32
    %c0_i32_1 = arith.constant 0 : i32
    return %arg0, %c0_i32, %c0_i32_0 : i32, i32, i32
  }
}

</mosaic_0001>

<bundles_post_ra>
// kernel: tpu_custom_call.1
= control target key start
LH: loop header
LB: loop body
LE: loop exit
PB: predicated region body
PF: predicated region fallthrough
CT: control target
= control target key end

     0   :  { %s2547_s0 = inlined_call_operand.vmem [shape: s32[32], index: 0, kind: input, shape index: {}]   ;;  %s2548_s1 = inlined_call_operand.vmem [shape: f32[8,16], index: 1, kind: input, shape index: {}]   ;;  %s2549_s2 = inlined_call_operand.vmem [shape: f32[16,8], index: 2, kind: input, shape index: {}]   ;;  %s2550_s3 = inlined_call_operand.hbm [shape: f32[16,16,16], index: 3, kind: input, shape index: {}]   ;;  %s2551_s4 = inlined_call_operand.hbm [shape: s32[2,8,64], index: 4, kind: output, shape index: {}]  }
   0x1   :  { %s9_s17 = sshll.u32 %s2547_s0, 4  ;;  %s10_s17 = int_to_ptr.vmem [resolvable:$true] %s9_s17 }
   0x2   :  { %s2051_s18 = scalar_lea.vmem %s10_s17, 16  ;;  %p2056_p1 = scmp.lt.s32.totalorder %s10_s17, %s10_s17 }
   0x3   :  { %p2052_p0 = scmp.ne.s32.totalorder %s10_s17, %s2051_s18  ;;  %p2057_p2 = scmp.lt.s32.totalorder %s2051_s18, %s2051_s18 }
   0x5   :  { %p2058_p3 = por %p2057_p2, %p2056_p1 }
   0x7   :  { %p2059_p4 = pnand %p2058_p3, %p2052_p0 }
   0x9   :  { %2062 = shalt.err (!%p2059_p4)  }
   0xa   :  { %s2163_s19 = smov [#allocation3]  }
   0xb   :  { %12 = dma.vmem_to_smem %s10_s17, 16, %s2163_s19, [#allocation2] }
   0xc   :  { %2137 = dma.done.wait [#allocation2], 16 }
   0xd   :  { %2138 = vsyncadd [#allocation2], 4294967280 }
   0xe   :  { %14 = sfence }
   0xf   :  { %15 = vsyncpa [#allocation5], 0 }
  0x10   :  { %17 = vsyncpa [#allocation5 + $0x1], 0 }
  0x11   :  { %18 = vsyncpa [#allocation6], 0 }
  0x12   :  { %20 = vsyncpa [#allocation6 + $0x1], 0  ;;  %s2206_s20 = smov 0   ;;  %s2208_s0 = smov 0  }
  0x13   :  { %s2210_s21 = smov 0   ;;  %s2212_s22 = smov 0  }
  0x14 LB: > { %s2227_s23 = sadd.s32 4294967295, %s2161_s22   ;;  %s1705_s24 = sadd.s32 4294967294, %s2161_s22   ;;  %s2161_s22 = sphi %s2212_s22, %s2576_s22   ;;  %s2157_s21 = sphi %s2210_s21, %s2575_s21   ;;  %s2153_s0 = sphi %s2208_s0, %s2574_s0   ;;  %s2149_s20 = sphi %s2206_s20, %s2573_s20  }
  0x15   : > { %s2231_s25 = sadd.s32 1, %s2161_s22   ;;  %s75_s26 = sadd.s32 1, %s2157_s21 }
  0x16   : > { %s72_s27 = ssub.s32 %s2161_s22, %s2231_s25  ;;  %p82_p5 = scmp.ne.s32.totalorder %s2157_s21, %s2153_s0 }
  0x17   : > { %p73_p6 = scmp.eq.s32.totalorder %s72_s27, 0  ;;  %p83_p7 = scmp.eq.s32.totalorder %s2161_s22, 0 }
  0x18   : > { %p88_p8 = scmp.ne.s32.totalorder %s2153_s0, %s2149_s20  ;;  %p89_p9 = scmp.eq.s32.totalorder %s2227_s23, 0 }
  0x19   : > { %s2243_s28 = scalar_select %p73_p6, %s2157_s21, %s75_s26  }
  0x1a   : > { %p2245_p10 = por %p83_p7, %p82_p5  ;;  %p2249_p11 = por %p89_p9, %p88_p8 }
  0x1b   : > { %p112_p12 = scmp.eq.s32.totalorder %s2227_s23, 1  ;;  %p118_p13 = scmp.eq.s32.totalorder %s1705_s24, 1 }
  0x1c   : > { %p2004_p1 = scmp.lt.s32.totalorder %s2161_s22, 2  ;;  %s144_s7 = sand.u32 1, %s2157_s21  }
  0x1d   : > { %p2256_p2 = por %p112_p12, %p82_p5  ;;  %p2260_p3 = por %p118_p13, %p88_p8 }
  0x1e   : > { %s1759_s8 = sshll.u32 %s2161_s22, 11  ;;  %s1708_s9 = sshll.u32 %s144_s7, 7 }
  0x1f   : > { %s2561_s5 = scalar_select %p2256_p2, 1, 0 }
  0x20   : > { %s2562_s6 = scalar_select %p2260_p3, 1, 0 }
  0x21   : > { %s2269_s12 = scalar_lea.hbm %s2550_s3, %s1759_s8  ;;  %s148_s13 = scalar_lea.vmem [#allocation4], %s1708_s9 }
  0x22   : > { %s156_s14 = sshll.u32 %s148_s13, 4  ;;  %p2273_p4 = pnand %p2004_p1, %p2245_p10  ;;  %s2277_s14 = int_to_ptr.vmem [resolvable:$true] %s156_s14 }
  0x23   : > { %s2279_s16 = scalar_lea.sflag [#allocation5], %s144_s7  ;;  %s2063_s17 = scalar_lea.hbm %s2269_s12, 2048 }
  0x24   : > { %p2064_p5 = scmp.ne.s32.totalorder %s2269_s12, %s2063_s17  ;;  %p2065_p6 = pneg %p2273_p4 }
  0x25   : > { %s2068_s24 = scalar_lea.hbm %s2550_s3, 4096  ;;  %p2069_p9 = scmp.lt.u32.totalorder %s2269_s12, %s2550_s3 }
  0x26   : > { %p2066_p7 = pnand %p2065_p6, %p2064_p5  ;;  %p2070_p10 = scmp.lt.u32.totalorder %s2068_s24, %s2063_s17 }
  0x27   : > { %p2072_p13 = scmp.lt.u32.totalorder %s2063_s17, %s2269_s12 }
  0x28   : > { %p2067_p8 = pneg %p2066_p7  ;;  %p2071_p12 = por %p2070_p10, %p2069_p9 }
  0x2a   : > { %p2073_p1 = por %p2072_p13, %p2071_p12 }
  0x2c   : > { %p2074_p0 = pnand %p2073_p1, %p2067_p8 }
  0x2e   : > { %2077 = shalt.err (!%p2074_p0)
}
  0x2f   : > { %s2078_s29 = scalar_lea.vmem %s2277_s14, 2048  ;;  %s2164_s7 = smov [#allocation4]  }
  0x30   : > { %p2079_p5 = scmp.ne.s32.totalorder %s2277_s14, %s2078_s29  ;;  %s2083_s8 = sshll.u32 %s2164_s7, 4  ;;  %s2084_s8 = int_to_ptr.vmem [resolvable:$false] %s2083_s8 }
  0x31   : > { %s2085_s9 = scalar_lea.vmem %s2084_s8, 4096  ;;  %p2086_p2 = scmp.lt.s32.totalorder %s2277_s14, %s2084_s8 }
  0x32   : > { %p2081_p7 = pnand %p2079_p5, %p2065_p6  ;;  %p2087_p9 = scmp.lt.s32.totalorder %s2085_s9, %s2078_s29 }
  0x34   : > { %p2082_p3 = pneg %p2081_p7  ;;  %p2088_p10 = por %p2087_p9, %p2086_p2 }
  0x36   : > { %p2089_p12 = pnand %p2088_p10, %p2082_p3 }
  0x38   : > { %2092 = shalt.err (!%p2089_p12)
}
  0x39   : > { %s2165_s10 = smov 128   ;;  %s2166_s11 = smov 8  }
  0x3a   : > { %1999 = dma.hbm_to_vmem [thread:$0]  (!%p2273_p4), %s2269_s12, 2048, %s2277_s14, %s2279_s16, %s2165_s10, %s2165_s10, %s2166_s11  }
  0x3b   : > { %p1712_p0 = scmp.ge.s32.totalorder %s2161_s22, 1  ;;  %p164_p6 = scmp.lt.s32.totalorder %s2161_s22, 3 }
  0x3d   : > { %p165_p8 = pnand %p1712_p0, %p164_p6 }
  0x3e   : > { %s2310_s13 = sand.u32 (!%p165_p8), 1, %s2153_s0  }
  0x3f   : > { %168 = sbr.rel (%p165_p8) target bundleno = 676 (0x2a4), region = 32  ;;  %s1713_s17 = sshll.u32 (!%p165_p8), %s2310_s13, 7 }
  0x40   : > { %s171_s18 = scalar_lea.sflag (!%p165_p8), [#allocation5], %s2310_s13  ;;  %s2314_s19 = scalar_lea.vmem (!%p165_p8), [#allocation4], %s1713_s17 }
  0x46   : > { %2140 = dma.done.wait (%p2249_p11), %s171_s18, 2048  }
  0x47   : > { %2142 = vsyncadd (%p2249_p11), %s171_s18, 4294965248  ;;  %s2321_s12 = sshll.u32 %s2227_s23, 4  ;;  %v2167_v0 = vmov 0.0|0.0   ;;  %vm2168_vm0 = vmmov 0   ;;  %v2169_v1 = vmov 0.0   ;;  %v223_v2 = vld [vmem:[%s2314_s19] sm:$0xff] }
  0x48   : > { %1941 = vmatprep.subr.bf16.mxu0 %v2167_v0  ;;  %1833 = vmatprep.mubr.msk.f32.mxu0 %vm2168_vm0, %v2169_v1  ;;  %s204_s30 = sadd.s32 1, %s2321_s12  ;;  %s2554_s14 = sadd.s32 2, %s2321_s12  ;;  %v224_v3 = vld [vmem:[%s2314_s19 + $0x8] sm:$0xff]  ;;  %v2352_v5 = vld [vmem:[%s2548_s1] sm:$0xff]  ;;  %v1720_v11 = vld [vmem:[%s2314_s19 + $0x10] sm:$0xff]  ;;  %vm225_vm1 = vcmask 130048  }
  0x49   : > { %s205_s15 = sld [smem:[#allocation3 + %s204_s30]]  ;;  %s377_s16 = sadd.s32 1, %s2554_s14  ;;  %1944 = vmatprep.subr.bf16.mxu1 %v2167_v0  ;;  %1840 = vmatprep.mubr.msk.f32.mxu1 %vm2168_vm0, %v2169_v1  ;;  %v1942_v4 = vpack.c.bf16 %v224_v3, %v223_v2  ;;  %v1721_v12 = vld [vmem:[%s2314_s19 + $0x18] sm:$0xff]  ;;  %v1725_v24 = vld [vmem:[%s2314_s19 + $0x20] sm:$0xff]  ;;  %v1726_v25 = vld [vmem:[%s2314_s19 + $0x28] sm:$0xff]  ;;  %vm1605_vm2 = vcmask 64512  }
  0x4a   : > { %s378_s24 = sld [smem:[#allocation3 + %s377_s16]]  ;;  %s2553_s26 = sadd.s32 4, %s2321_s12  ;;  %v1948_v19 = vpack.c.bf16 %v1721_v12, %v1720_v11  ;;  %v1954_v30 = vpack.c.bf16 %v1726_v25, %v1725_v24  ;;  %v1730_v32 = vld [vmem:[%s2314_s19 + $0x30] sm:$0xff]  ;;  %v1731_v33 = vld [vmem:[%s2314_s19 + $0x38] sm:$0xff]  ;;  %v2393_v34 = vld [vmem:[%s2549_s2] sm:$0xff]  ;;  %vm1608_vm3 = vcmask 195584  }
  0x4b   : > { %s549_s27 = sadd.s32 1, %s2553_s26  ;;  %s1765_s29 = sadd.s32 6, %s2321_s12  ;;  %1943 = vmatpush3.bf16.msra.mxu0 %v1942_v4  ;;  %v2400_v39 = vld [vmem:[%s2549_s2 + $0x8] sm:$0xff]  ;;  %v1960_v40 = vpack.c.bf16 %v1731_v33, %v1730_v32  ;;  %v1735_v42 = vld [vmem:[%s2314_s19 + $0x40] sm:$0xff]  ;;  %v1740_v55 = vld [vmem:[%s2314_s19 + $0x50] sm:$0xff]  ;;  %vm1610_vm4 = vcmask 261120  }
  0x4c   : > { %s550_s7 = sld [smem:[#allocation3 + %s549_s27]]  ;;  %s721_s8 = sadd.s32 1, %s1765_s29  ;;  %1947 = vmatprep.subr.bf16.mxu0 %v2167_v0  ;;  %v1736_v43 = vld [vmem:[%s2314_s19 + $0x48] sm:$0xff]  ;;  %v1741_v56 = vld [vmem:[%s2314_s19 + $0x58] sm:$0xff]  ;;  %v1745_v4 = vld [vmem:[%s2314_s19 + $0x60] sm:$0xff]  ;;  %vm1612_vm5 = vcmask 326656  }
  0x4d   : > { %s722_s9 = sld [smem:[#allocation3 + %s721_s8]]  ;;  %s2555_s10 = sadd.s32 8, %s2321_s12  ;;  %v1966_v51 = vpack.c.bf16 %v1736_v43, %v1735_v42  ;;  %v1972_v63 = vpack.c.bf16 %v1741_v56, %v1740_v55  ;;  %v1750_v11 = vld [vmem:[%s2314_s19 + $0x70] sm:$0xff]  ;;  %v1751_v12 = vld [vmem:[%s2314_s19 + $0x78] sm:$0xff]  ;;  %vm1614_vm6 = vcmask 392192   ;;  %vm1616_vm7 = vcmask 457728  }
  0x4e   : > { %s893_s11 = sadd.s32 1, %s2555_s10  ;;  %s2556_s17 = sadd.s32 10, %s2321_s12  ;;  %vm1619_vm8 = vcmask 523264  }
  0x4f   : > { %s206_s18 = scvt.s32.f32 %s205_s15  ;;  %s2345_s30 = sld [smem:[#allocation3 + %s893_s11]] }
  0x50   : > { %s379_s16 = scvt.s32.f32 %s378_s24  ;;  %s1065_s26 = sadd.s32 1, %s2556_s17 }
  0x51   : > { %s207_s8 = sadd.f32 -4.5, %s206_s18  ;;  %s2354_s10 = sld [smem:[#allocation3 + %s1065_s26]] }
  0x52   : > { %s380_s15 = sadd.f32 -4.5, %s379_s16  ;;  %s551_s11 = scvt.s32.f32 %s550_s7 }
  0x53   : > { %v208_v6 = vstv %s207_s8  ;;  %s723_s24 = scvt.s32.f32 %s722_s9  ;;  %s2558_s17 = sadd.s32 12, %s2321_s12 }
  0x54   : > { %v209_v7 = vsub.f32 %v208_v6, %v2352_v5  ;;  %v381_v8 = vstv %s380_s15  ;;  %s552_s14 = sadd.f32 -4.5, %s551_s11  ;;  %s1237_s27 = sadd.s32 1, %s2558_s17  ;;  %v1746_v6 = vld [vmem:[%s2314_s19 + $0x68] sm:$0xff] }
  0x55   : > { %v382_v9 = vsub.f32 %v381_v8, %v2352_v5  ;;  %s724_s26 = sadd.f32 -4.5, %s723_s24  ;;  %s895_s18 = scvt.s32.f32 %s2345_s30 }
  0x56   : > { %v210_v10 = vand.u32 2147483647, %v209_v7  ;;  %v553_v13 = vstv %s552_s14  ;;  %s2365_s7 = sld [smem:[#allocation3 + %s1237_s27]]  ;;  %s2557_s9 = sadd.s32 14, %s2321_s12 }
  0x57   : > { %v383_v14 = vand.u32 2147483647, %v382_v9  ;;  %v554_v15 = vsub.f32 %v553_v13, %v2352_v5  ;;  %v725_v16 = vstv %s724_s26  ;;  %s896_s16 = sadd.f32 -4.5, %s895_s18  ;;  %s1067_s8 = scvt.s32.f32 %s2354_s10 }
  0x58   : > { %v211_v17 = vsub.f32 1.0, %v210_v10  ;;  %v726_v18 = vsub.f32 %v725_v16, %v2352_v5  ;;  %s1409_s30 = sadd.s32 1, %s2557_s9  ;;  %s2374_s15 = sld [smem:[#allocation3 + %s2321_s12]] }
  0x59   : > { %v384_v20 = vsub.f32 1.0, %v383_v14  ;;  %v555_v21 = vand.u32 2147483647, %v554_v15  ;;  %v897_v22 = vstv %s896_s16  ;;  %s1068_s11 = sadd.f32 -4.5, %s1067_s8  ;;  %s2376_s24 = sld [smem:[#allocation3 + %s1409_s30]]  ;;  %v1984_v15 = vpack.c.bf16 %v1751_v12, %v1750_v11 }
  0x5a   : > { %v212_v23 = vmax.f32 %v211_v17, 0.0  ;;  %v727_v28 = vand.u32 2147483647, %v726_v18  ;;  %v898_v29 = vsub.f32 %v897_v22, %v2352_v5  ;;  %s2564_s19 = sadd.s32 2, %s2321_s12  ;;  %p2570_p2 = scmp.ne.s32.totalorder %s2561_s5, 0 }
  0x5b   : > { %v385_v26 = vmax.f32 %v384_v20, 0.0  ;;  %v556_v27 = vsub.f32 1.0, %v555_v21  ;;  %v1069_v31 = vstv %s1068_s11  ;;  %s375_s11 = sld [smem:[#allocation3 + %s2564_s19]] }
  0x5c   : > { %1834 = vmatmul.mubr.msk.f32.vlgmr.msra.gmra.mrb[0].mxu0 %vm225_vm1, %v212_v23  ;;  %s1239_s10 = scvt.s32.f32 %s2365_s7  ;;  %v728_v36 = vsub.f32 1.0, %v727_v28  ;;  %v899_v37 = vand.u32 2147483647, %v898_v29  ;;  %v1070_v38 = vsub.f32 %v1069_v31, %v2352_v5 }
  0x5d   : > { %1949 = vmatpush3.bf16.msra.mxu0 %v1948_v19  ;;  %1847 = vmatprep.mubr.msk.f32.mxu0 %vm2168_vm0, %v2169_v1  ;;  %v557_v35 = vmax.f32 %v556_v27, 0.0 }
  0x5e   : > { %1953 = vmatprep.subr.bf16.mxu0 %v2167_v0  ;;  %s1240_s14 = sadd.f32 -4.5, %s1239_s10  ;;  %s203_s27 = scvt.s32.f32 %s2374_s15  ;;  %v729_v47 = vmax.f32 %v728_v36, 0.0  ;;  %v900_v48 = vsub.f32 1.0, %v899_v37  ;;  %v1071_v49 = vand.u32 2147483647, %v1070_v38 }
  0x5f   : > { %s1411_s26 = scvt.s32.f32 %s2376_s24  ;;  %s2565_s24 = sadd.s32 4, %s2321_s12 }
  0x60   : > { %1848 = vmatmul.mubr.msk.f32.vlgmr.msra.gmra.mrb[2].mxu0 %vm225_vm1, %v385_v26  ;;  %s213_s30 = sadd.f32 -4.5, %s203_s27  ;;  %v1241_v41 = vstv %s1240_s14  ;;  %v901_v59 = vmax.f32 %v900_v48, 0.0  ;;  %v1072_v60 = vsub.f32 1.0, %v1071_v49  ;;  %s547_s10 = sld [smem:[#allocation3 + %s2565_s24]] }
  0x61   : > { %1955 = vmatpush3.bf16.msra.mxu0 %v1954_v30  ;;  %1861 = vmatprep.mubr.msk.f32.mxu0 %vm2168_vm0, %v2169_v1  ;;  %s1412_s15 = sadd.f32 -4.5, %s1411_s26  ;;  %v1242_v50 = vsub.f32 %v1241_v41, %v2352_v5  ;;  %s719_s14 = sld [smem:[#allocation3 + %s1765_s29]] }
  0x62   : > { %1959 = vmatprep.subr.bf16.mxu0 %v2167_v0  ;;  %v214_v44 = vstv %s213_s30  ;;  %v1073_v8 = vmax.f32 %v1072_v60, 0.0  ;;  %s376_s27 = scvt.s32.f32 %s375_s11  ;;  %s2566_s26 = sadd.s32 8, %s2321_s12 }
  0x63   : > { %v215_v45 = vsub.f32 %v214_v44, %v2393_v34  ;;  %v216_v46 = vsub.f32 %v214_v44, %v2400_v39  ;;  %v1413_v52 = vstv %s1412_s15  ;;  %v1243_v61 = vand.u32 2147483647, %v1242_v50  ;;  %s891_s18 = sld [smem:[#allocation3 + %s2566_s26]]  ;;  %s2567_s30 = sadd.s32 10, %s2321_s12 }
  0x64   : > { %1862 = vmatmul.mubr.msk.f32.vlgmr.msra.gmra.mrb[4].mxu0 %vm225_vm1, %v557_v35  ;;  %v1414_v62 = vsub.f32 %v1413_v52, %v2352_v5  ;;  %v1978_v5 = vpack.c.bf16 %v1746_v6, %v1745_v4  ;;  %s386_s16 = sadd.f32 -4.5, %s376_s27  ;;  %s1063_s15 = sld [smem:[#allocation3 + %s2567_s30]] }
  0x65   : > { %1961 = vmatpush3.bf16.msra.mxu0 %v1960_v40  ;;  %1875 = vmatprep.mubr.msk.f32.mxu0 %vm2168_vm0, %v2169_v1  ;;  %v217_v53 = vand.u32 2147483647, %v215_v45  ;;  %v218_v54 = vand.u32 2147483647, %v216_v46  ;;  %v1244_v9 = vsub.f32 1.0, %v1243_v61  ;;  %s2568_s24 = sadd.s32 12, %s2321_s12 }
  0x66   : > { %1965 = vmatprep.subr.bf16.mxu0 %v2167_v0  ;;  %v1415_v10 = vand.u32 2147483647, %v1414_v62  ;;  %s548_s7 = scvt.s32.f32 %s547_s10  ;;  %v387_v17 = vstv %s386_s16  ;;  %s1235_s29 = sld [smem:[#allocation3 + %s2568_s24]] }
  0x67   : > { %v219_v57 = vsub.f32 1.0, %v217_v53  ;;  %v220_v58 = vsub.f32 1.0, %v218_v54  ;;  %v1245_v13 = vmax.f32 %v1244_v9, 0.0  ;;  %s720_s8 = scvt.s32.f32 %s719_s14  ;;  %v388_v18 = vsub.f32 %v387_v17, %v2393_v34  ;;  %s2569_s14 = sadd.s32 14, %s2321_s12 }
  0x68   : > { %1876 = vmatmul.mubr.msk.f32.vlgmr.msra.gmra.mrb[6].mxu0 %vm225_vm1, %v729_v47  ;;  %v1416_v14 = vsub.f32 1.0, %v1415_v10  ;;  %s558_s9 = sadd.f32 -4.5, %s548_s7  ;;  %v389_v19 = vsub.f32 %v387_v17, %v2400_v39  ;;  %s2456_s27 = sld [smem:[#allocation3 + %s2569_s14]] }
  0x69   : > { %1967 = vmatpush3.bf16.msra.mxu0 %v1966_v51  ;;  %1889 = vmatprep.mubr.msk.f32.mxu0 %vm2168_vm0, %v2169_v1  ;;  %v221_v2 = vmax.f32 %v219_v57, 0.0  ;;  %v222_v3 = vmax.f32 %v220_v58, 0.0  ;;  %s730_s17 = sadd.f32 -4.5, %s720_s8  ;;  %s892_s19 = scvt.s32.f32 %s891_s18  ;;  %v390_v21 = vand.u32 2147483647, %v388_v18 }
  0x6a   : > { %1971 = vmatprep.subr.bf16.mxu0 %v2167_v0  ;;  %v1417_v16 = vmax.f32 %v1416_v14, 0.0  ;;  %v559_v20 = vstv %s558_s9  ;;  %v391_v23 = vand.u32 2147483647, %v389_v19  ;;  %s1064_s10 = scvt.s32.f32 %s1063_s15  ;;  %s2170_s16 = smov 8  }
  0x6b   : > { %v1945_v7 = vpack.c.bf16 %v222_v3, %v221_v2  ;;  %v731_v22 = vstv %s730_s17  ;;  %s902_s11 = sadd.f32 -4.5, %s892_s19  ;;  %v560_v24 = vsub.f32 %v559_v20, %v2393_v34  ;;  %v561_v25 = vsub.f32 %v559_v20, %v2400_v39  ;;  %s2171_s7 = smov 16  }
  0x6c   : > { %1890 = vmatmul.mubr.msk.f32.vlgmr.msra.gmra.mrb[8].mxu0 %vm225_vm1, %v901_v59  ;;  %v732_v26 = vsub.f32 %v731_v22, %v2393_v34  ;;  %v733_v27 = vsub.f32 %v731_v22, %v2400_v39  ;;  %v392_v28 = vsub.f32 1.0, %v390_v21  ;;  %v393_v30 = vsub.f32 1.0, %v391_v23  ;;  %s1074_s17 = sadd.f32 -4.5, %s1064_s10  ;;  %s1236_s9 = scvt.s32.f32 %s1235_s29 }
  0x6d   : > { %1973 = vmatpush3.bf16.msra.mxu0 %v1972_v63  ;;  %1903 = vmatprep.mubr.msk.f32.mxu0 %vm2168_vm0, %v2169_v1  ;;  %v903_v29 = vstv %s902_s11  ;;  %v562_v31 = vand.u32 2147483647, %v560_v24  ;;  %v563_v32 = vand.u32 2147483647, %v561_v25  ;;  %s2172_s8 = smov 24   ;;  %s2173_s30 = smov 32  }
  0x6e   : > { %1977 = vmatprep.subr.bf16.mxu0 %v2167_v0  ;;  %1946 = vmatpush3.bf16.msra.mxu1 %v1945_v7  ;;  %v734_v33 = vand.u32 2147483647, %v732_v26  ;;  %v735_v35 = vand.u32 2147483647, %v733_v27  ;;  %v904_v36 = vsub.f32 %v903_v29, %v2393_v34  ;;  %v394_v37 = vmax.f32 %v392_v28, 0.0  ;;  %s1246_s12 = sadd.f32 -4.5, %s1236_s9  ;;  %s1408_s26 = scvt.s32.f32 %s2456_s27 }
  0x6f   : > { %1950 = vmatprep.subr.bf16.mxu1 %v2167_v0  ;;  %v905_v38 = vsub.f32 %v903_v29, %v2400_v39  ;;  %v395_v40 = vmax.f32 %v393_v30, 0.0  ;;  %v564_v41 = vsub.f32 1.0, %v562_v31  ;;  %v565_v42 = vsub.f32 1.0, %v563_v32  ;;  %s2174_s15 = smov 40   ;;  %s2175_s19 = smov 48  }
  0x70   : > { %1904 = vmatmul.mubr.msk.f32.vlgmr.msra.gmra.mrb[10].mxu0 %vm225_vm1, %v1073_v8  ;;  %v1075_v43 = vstv %s1074_s17  ;;  %v736_v44 = vsub.f32 1.0, %v734_v33  ;;  %v737_v45 = vsub.f32 1.0, %v735_v35  ;;  %v906_v46 = vand.u32 2147483647, %v904_v36  ;;  %s1418_s18 = sadd.f32 -4.5, %s1408_s26  ;;  %s2176_s24 = smov 56  }
  0x71   : > { %1979 = vmatpush3.bf16.msra.mxu0 %v1978_v5  ;;  %1917 = vmatprep.mubr.msk.f32.mxu0 %vm2168_vm0, %v2169_v1  ;;  %v907_v47 = vand.u32 2147483647, %v905_v38  ;;  %v1076_v48 = vsub.f32 %v1075_v43, %v2393_v34  ;;  %v1077_v49 = vsub.f32 %v1075_v43, %v2400_v39  ;;  %v1951_v50 = vpack.c.bf16 %v395_v40, %v394_v37  ;;  %s1714_s29 = sshll.u32 %s2310_s13, 3  ;;  %s1755_s11 = sshll.u32 %s2227_s23, 7 }
  0x72   : > { %1983 = vmatprep.subr.bf16.mxu0 %v2167_v0  ;;  %v566_v51 = vmax.f32 %v564_v41, 0.0  ;;  %v567_v52 = vmax.f32 %v565_v42, 0.0  ;;  %v1247_v53 = vstv %s1246_s12  ;;  %v738_v55 = vmax.f32 %v736_v44, 0.0  ;;  %s196_s10 = scalar_lea.vmem [#allocation7], %s1714_s29  ;;  %s2503_s9 = scalar_lea.hbm %s2551_s4, %s1755_s11 }
  0x73   : > { %v739_v56 = vmax.f32 %v737_v45, 0.0  ;;  %v908_v57 = vsub.f32 1.0, %v906_v46  ;;  %v909_v59 = vsub.f32 1.0, %v907_v47  ;;  %v1078_v60 = vand.u32 2147483647, %v1076_v48  ;;  %s1635_s14 = sshll.u32 %s196_s10, 4  ;;  %s2505_s14 = int_to_ptr.vmem [resolvable:$true] %s1635_s14 }
  0x74   : > { %1918 = vmatmul.mubr.msk.f32.vlgmr.msra.gmra.mrb[12].mxu0 %vm225_vm1, %v1245_v13  ;;  %v1079_v61 = vand.u32 2147483647, %v1077_v49  ;;  %v1957_v62 = vpack.c.bf16 %v567_v52, %v566_v51  ;;  %v1248_v63 = vsub.f32 %v1247_v53, %v2393_v34  ;;  %v1249_v2 = vsub.f32 %v1247_v53, %v2400_v39  ;;  %s1622_s12 = scalar_lea.sflag [#allocation6], %s2310_s13  ;;  %s2093_s23 = scalar_lea.vmem %s2505_s14, 128 }
  0x75   : > { %1985 = vmatpush3.bf16.msra.mxu0 %v1984_v15  ;;  %1931 = vmatprep.mubr.msk.f32.mxu0 %vm2168_vm0, %v2169_v1  ;;  %v1419_v3 = vstv %s1418_s18  ;;  %v1963_v6 = vpack.c.bf16 %v739_v56, %v738_v55  ;;  %v910_v8 = vmax.f32 %v908_v57, 0.0  ;;  %v911_v9 = vmax.f32 %v909_v59, 0.0  ;;  %p2094_p11 = scmp.ne.s32.totalorder %s2505_s14, %s2093_s23  ;;  %s2177_s26 = smov [#allocation7]  }
  0x76   : > { %v1080_v10 = vsub.f32 1.0, %v1078_v60  ;;  %v1081_v5 = vsub.f32 1.0, %v1079_v61  ;;  %v1250_v11 = vand.u32 2147483647, %v1248_v63  ;;  %v1251_v12 = vand.u32 2147483647, %v1249_v2 }
  0x77   : > { %v1420_v13 = vsub.f32 %v1419_v3, %v2393_v34  ;;  %v1421_v14 = vsub.f32 %v1419_v3, %v2400_v39  ;;  %v1969_v17 = vpack.c.bf16 %v911_v9, %v910_v8  ;;  %p2095_p3 = pnand %p2094_p11, %p2570_p2  ;;  %s2097_s18 = sshll.u32 %s2177_s26, 4  ;;  %s2098_s18 = int_to_ptr.vmem [resolvable:$false] %s2097_s18 }
  0x78   : > { %1932 = vmatmul.mubr.msk.f32.vlgmr.msra.gmra.mrb[14].mxu0 %vm225_vm1, %v1417_v16  ;;  %v1082_v18 = vmax.f32 %v1080_v10, 0.0  ;;  %v1083_v19 = vmax.f32 %v1081_v5, 0.0  ;;  %v1252_v20 = vsub.f32 1.0, %v1250_v11  ;;  %v1253_v21 = vsub.f32 1.0, %v1251_v12  ;;  %p2100_p13 = scmp.lt.s32.totalorder %s2505_s14, %s2098_s18 }
  0x79   : > { %v1422_v22 = vand.u32 2147483647, %v1420_v13  ;;  %v1423_v23 = vand.u32 2147483647, %v1421_v14  ;;  %p2096_p4 = pneg %p2095_p3 }
  0x7a   : > { %v1975_v24 = vpack.c.bf16 %v1083_v19, %v1082_v18  ;;  %v1254_v25 = vmax.f32 %v1252_v20, 0.0  ;;  %v1255_v26 = vmax.f32 %v1253_v21, 0.0 }
  0x7b   : > { %v1424_v27 = vsub.f32 1.0, %v1422_v22  ;;  %v1425_v28 = vsub.f32 1.0, %v1423_v23 }
  0x7c   : > { %v1981_v31 = vpack.c.bf16 %v1255_v26, %v1254_v25 }
  0x7d   : > { %v1426_v32 = vmax.f32 %v1424_v27, 0.0  ;;  %v1427_v33 = vmax.f32 %v1425_v28, 0.0 }
  0x7f   : > { %v1987_v37 = vpack.c.bf16 %v1427_v33, %v1426_v32 }
 0x12f   : > { %v295_v54 = vpop.f32.mrb[0].mxu0 }
 0x130   : > { %v1835_v58 = vpop.f32.mrb[1].mxu0  ;;  %1841 = vmatmul.mubr.msk.f32.vlgmr.msra.gmra.mrb[0].mxu1 %vm225_vm1, %v295_v54 }
 0x131   : > { %1952 = vmatpush3.bf16.msra.mxu1 %v1951_v50  ;;  %1854 = vmatprep.mubr.msk.f32.mxu1 %vm2168_vm0, %v2169_v1 }
 0x132   : > { %1956 = vmatprep.subr.bf16.mxu1 %v2167_v0 }
 0x133   : > { %v468_v4 = vpop.f32.mrb[2].mxu0 }
 0x134   : > { %v1849_v7 = vpop.f32.mrb[3].mxu0  ;;  %1855 = vmatmul.mubr.msk.f32.vlgmr.msra.gmra.mrb[2].mxu1 %vm225_vm1, %v468_v4 }
 0x135   : > { %1958 = vmatpush3.bf16.msra.mxu1 %v1957_v62  ;;  %1868 = vmatprep.mubr.msk.f32.mxu1 %vm2168_vm0, %v2169_v1 }
 0x136   : > { %1962 = vmatprep.subr.bf16.mxu1 %v2167_v0 }
 0x137   : > { %v640_v15 = vpop.f32.mrb[4].mxu0 }
 0x138   : > { %v1863_v16 = vpop.f32.mrb[5].mxu0  ;;  %1869 = vmatmul.mubr.msk.f32.vlgmr.msra.gmra.mrb[4].mxu1 %vm225_vm1, %v640_v15 }
 0x139   : > { %1964 = vmatpush3.bf16.msra.mxu1 %v1963_v6  ;;  %1882 = vmatprep.mubr.msk.f32.mxu1 %vm2168_vm0, %v2169_v1 }
 0x13a   : > { %1968 = vmatprep.subr.bf16.mxu1 %v2167_v0 }
 0x13b   : > { %v812_v34 = vpop.f32.mrb[6].mxu0 }
 0x13c   : > { %v1877_v39 = vpop.f32.mrb[7].mxu0  ;;  %1883 = vmatmul.mubr.msk.f32.vlgmr.msra.gmra.mrb[6].mxu1 %vm225_vm1, %v812_v34 }
 0x13d   : > { %1970 = vmatpush3.bf16.msra.mxu1 %v1969_v17  ;;  %1896 = vmatprep.mubr.msk.f32.mxu1 %vm2168_vm0, %v2169_v1 }
 0x13e   : > { %1974 = vmatprep.subr.bf16.mxu1 %v2167_v0 }
 0x13f   : > { %v984_v29 = vpop.f32.mrb[8].mxu0 }
 0x140   : > { %v1891_v30 = vpop.f32.mrb[9].mxu0  ;;  %1897 = vmatmul.mubr.msk.f32.vlgmr.msra.gmra.mrb[8].mxu1 %vm225_vm1, %v984_v29 }
 0x141   : > { %1976 = vmatpush3.bf16.msra.mxu1 %v1975_v24  ;;  %1910 = vmatprep.mubr.msk.f32.mxu1 %vm2168_vm0, %v2169_v1 }
 0x142   : > { %1980 = vmatprep.subr.bf16.mxu1 %v2167_v0 }
 0x143   : > { %v1156_v35 = vpop.f32.mrb[10].mxu0 }
 0x144   : > { %v1905_v36 = vpop.f32.mrb[11].mxu0  ;;  %1911 = vmatmul.mubr.msk.f32.vlgmr.msra.gmra.mrb[10].mxu1 %vm225_vm1, %v1156_v35 }
 0x145   : > { %1982 = vmatpush3.bf16.msra.mxu1 %v1981_v31  ;;  %1924 = vmatprep.mubr.msk.f32.mxu1 %vm2168_vm0, %v2169_v1 }
 0x146   : > { %1986 = vmatprep.subr.bf16.mxu1 %v2167_v0 }
 0x147   : > { %v1328_v38 = vpop.f32.mrb[12].mxu0 }
 0x148   : > { %v1919_v40 = vpop.f32.mrb[13].mxu0  ;;  %1925 = vmatmul.mubr.msk.f32.vlgmr.msra.gmra.mrb[12].mxu1 %vm225_vm1, %v1328_v38 }
 0x149   : > { %1988 = vmatpush3.bf16.msra.mxu1 %v1987_v37  ;;  %1938 = vmatprep.mubr.msk.f32.mxu1 %vm2168_vm0, %v2169_v1 }
 0x14b   : > { %v1500_v41 = vpop.f32.mrb[14].mxu0 }
 0x14c   : > { %v1933_v42 = vpop.f32.mrb[15].mxu0  ;;  %1939 = vmatmul.mubr.msk.f32.vlgmr.msra.gmra.mrb[14].mxu1 %vm225_vm1, %v1500_v41 }
 0x203   : > { %v368_v43 = vpop.f32.mrb[0].mxu1 }
 0x204   : > { %v1842_v44 = vpop.f32.mrb[1].mxu1 }
 0x207   : > { %v541_v45 = vpop.f32.mrb[2].mxu1 }
 0x208   : > { %1578 = vrot.lane.b32.xlu0 %v541_v45, %s2170_s16  ;;  %v1856_v46 = vpop.f32.mrb[3].mxu1  ;;  %s2099_s16 = scalar_lea.vmem %s2098_s18, 256 }
 0x209   : > { %p2101_p1 = scmp.lt.s32.totalorder %s2099_s16, %s2093_s23 }
 0x20b   : > { %v713_v47 = vpop.f32.mrb[4].mxu1  ;;  %p2102_p5 = por %p2101_p1, %p2100_p13 }
 0x20c   : > { %1582 = vrot.lane.b32.xlu0 %v713_v47, %s2171_s7  ;;  %v1870_v0 = vpop.f32.mrb[5].mxu1 }
 0x20d   : > { %p2103_p7 = pnand %p2102_p5, %p2096_p4 }
 0x20f   : > { %v885_v48 = vpop.f32.mrb[6].mxu1 }
 0x210   : > { %1586 = vrot.lane.b32.xlu1 %v885_v48, %s2172_s8  ;;  %v1884_v49 = vpop.f32.mrb[7].mxu1 }
 0x213   : > { %v1057_v50 = vpop.f32.mrb[8].mxu1 }
 0x214   : > { %1590 = vrot.lane.b32.xlu1 %v1057_v50, %s2173_s30  ;;  %v1898_v1 = vpop.f32.mrb[9].mxu1 }
 0x217   : > { %v1229_v51 = vpop.f32.mrb[10].mxu1 }
 0x218   : > { %1594 = vrot.lane.b32.xlu0 %v1229_v51, %s2174_s15  ;;  %v1912_v52 = vpop.f32.mrb[11].mxu1 }
 0x21b   : > { %v1401_v53 = vpop.f32.mrb[12].mxu1 }
 0x21c   : > { %1598 = vrot.lane.b32.xlu1 %v1401_v53, %s2175_s19  ;;  %v1926_v54 = vpop.f32.mrb[13].mxu1 }
 0x21f   : > { %v1573_v55 = vpop.f32.mrb[14].mxu1 }
 0x220   : > { %1602 = vrot.lane.b32.xlu0 %v1573_v55, %s2176_s24  ;;  %v1940_v56 = vpop.f32.mrb[15].mxu1 }
 0x27a   : > { %v1579_v57 = vpop.permute.xlu0 %1578 }
 0x27b   : > { %v1606_v61 = vsel %vm1605_vm2, %v368_v43, %v1579_v57 }
 0x27e   : > { %v1583_v59 = vpop.permute.xlu0 %1582 }
 0x27f   : > { %v1607_v62 = vsel %vm225_vm1, %v1606_v61, %v1583_v59 }
 0x282   : > { %v1587_v58 = vpop.permute.xlu1 %1586 }
 0x283   : > { %v1609_v2 = vsel %vm1608_vm3, %v1607_v62, %v1587_v58 }
 0x286   : > { %v1591_v60 = vpop.permute.xlu1 %1590 }
 0x287   : > { %v1611_v4 = vsel %vm1610_vm4, %v1609_v2, %v1591_v60 }
 0x28a   : > { %v1595_v63 = vpop.permute.xlu0 %1594 }
 0x28b   : > { %v1613_v6 = vsel %vm1612_vm5, %v1611_v4, %v1595_v63 }
 0x28e   : > { %v1599_v3 = vpop.permute.xlu1 %1598 }
 0x28f   : > { %v1615_v7 = vsel %vm1614_vm6, %v1613_v6, %v1599_v3 }
 0x292   : > { %v1603_v8 = vpop.permute.xlu0 %1602 }
 0x293   : > { %v1617_v9 = vsel %vm1616_vm7, %v1615_v7, %v1603_v8 }
 0x294   : > { %v1991_v10 = vcvt.f32.s32 %v1617_v9 }
 0x296   : > { %1620 = vst.msk [vmem:[%s196_s10] sm:$0xff] %vm1619_vm8, %v1991_v10 }
 0x297   : > { %2106 = shalt.err (!%p2103_p7)
}
 0x298   : > { %s2107_s13 = scalar_lea.hbm %s2503_s9, 128  ;;  %s2111_s30 = scalar_lea.hbm %s2551_s4, 256 }
 0x299   : > { %p2108_p9 = scmp.ne.s32.totalorder %s2503_s9, %s2107_s13  ;;  %p2112_p0 = scmp.lt.u32.totalorder %s2503_s9, %s2551_s4 }
 0x29a   : > { %p2113_p6 = scmp.lt.u32.totalorder %s2111_s30, %s2107_s13  ;;  %p2115_p11 = scmp.lt.u32.totalorder %s2107_s13, %s2503_s9 }
 0x29b   : > { %p2109_p10 = pnand %p2108_p9, %p2570_p2 }
 0x29c   : > { %p2114_p8 = por %p2113_p6, %p2112_p0 }
 0x29d   : > { %p2110_p12 = pneg %p2109_p10 }
 0x29e   : > { %p2116_p3 = por %p2115_p11, %p2114_p8 }
 0x2a0   : > { %p2117_p4 = pnand %p2116_p3, %p2110_p12 }
 0x2a2   : > { %2120 = shalt.err (!%p2117_p4)
}
 0x2a3   : > { %1994 = dma.vmem_to_hbm [thread:$0]  (%p2570_p2), %s2505_s14, 128, %s2503_s9, %s1622_s12  }
 0x2a4 PF: > { %s1647_s24 = sand.u32 1, %s2149_s20   ;;  %p2571_p13 = scmp.ne.s32.totalorder %s2562_s6, 0 }
 0x2a5   : > { %p2572_p1 = scmp.ge.s32.totalorder %s2161_s22, 2  ;;  %s1648_s29 = scalar_lea.sflag [#allocation6], %s1647_s24 }
 0x2a7   : > { %p2001_p5 = pnand %p2572_p1, %p2571_p13 }
 0x2a9   : > { %2144 = dma.done.wait (!%p2001_p5), %s1648_s29, 128  }
 0x2aa   : > { %2146 = vsyncadd (!%p2001_p5), %s1648_s29, 4294967168  ;;  %p23_p7 = scmp.ge.s32.totalorder %s2231_s25, 4   ;;  %s2573_s20 = smov %s2153_s0 }
 0x2ab   : > { %s2574_s0 = smov %s2157_s21  ;;  %s2575_s21 = smov %s2243_s28 }
 0x2ac   : > { %s2576_s22 = smov %s2231_s25  ;;  %25 = sbr.rel (!%p23_p7) target bundleno = 20 (0x14), region = 84 }
 0x2b3   :  { %1653 = vsyncpa [#allocation5], 1 }
 0x2b4   :  { %1655 = vsyncpa [#allocation5 + $0x1], 1 }
 0x2b5   :  { %1656 = vsyncpa [#allocation6], 1 }
 0x2b6   :  { %1658 = vsyncpa [#allocation6 + $0x1], 1 }

</bundles_post_ra>
